<compile_context>
chip_gen: v7x
topology: tpu7x:2x2x1
jax: 0.10.0
libtpu: 0.0.40
codegen_flags: <defaults>
</compile_context>

<pallas_src>
import functools
import numpy as np
import jax
import jax.numpy as jnp
from jax.experimental import pallas as pl
from jax.experimental.pallas import tpu as pltpu

# bf16 MXU inputs with f32 accumulation (v6e/v7x feedback); epilogue stays f32.
MXU_INPUT_DTYPE = jnp.bfloat16


# ----------------------------------------------------------------------------
# Pallas kernel: fused (Cout,K)x(K,M) matmul + bias + optional summands + ReLU.
# Output is lane-dense: M (pixels) on the lane axis, Cout on sublanes.
# ----------------------------------------------------------------------------
def _convT_kernel(w_ref, x_ref, b_ref, *rest, n_extra, apply_relu):
    extra_refs = rest[:n_extra]
    o_ref = rest[n_extra]
    y = jnp.dot(w_ref[...], x_ref[...], preferred_element_type=jnp.float32)
    y = y + b_ref[...]                      # (Cout,1) broadcast along lanes
    for r in extra_refs:
        y = y + r[...]
    if apply_relu:
        y = jnp.maximum(y, 0.0)
    o_ref[...] = y.astype(o_ref.dtype)


def fused_convT(wT, colsT, bias, extras=(), apply_relu=True):
    """wT: (Cout,K) BN-folded weights; colsT: (K,M) im2col columns (pixels on
    lanes); bias: (Cout,); extras: tuple of (Cout,M) f32 addends fused before the
    optional ReLU.  Single VMEM block, no grid, no padding (everything fits)."""
    Cout, K = wT.shape
    M = colsT.shape[1]
    b2 = bias.reshape(Cout, 1).astype(jnp.float32)
    w_in = wT.astype(MXU_INPUT_DTYPE)
    x_in = colsT.astype(MXU_INPUT_DTYPE)
    ex = tuple(e.astype(jnp.float32) for e in extras)
    kernel = functools.partial(_convT_kernel, n_extra=len(ex), apply_relu=apply_relu)
    vmem = pl.BlockSpec(memory_space=pltpu.MemorySpace.VMEM)
    return pl.pallas_call(
        kernel,
        out_shape=jax.ShapeDtypeStruct((Cout, M), jnp.float32),
        in_specs=[vmem] * (3 + len(ex)),
        out_specs=pl.BlockSpec(memory_space=pltpu.MemorySpace.VMEM),
    )(w_in, x_in, b2, *ex)


# ----------------------------------------------------------------------------
# Plain-JAX glue (layout: (C, N, H, W), pixels flattened onto the lane axis)
# ----------------------------------------------------------------------------
def _im2colT(x, kh, kw):
    """x: (C,N,H,W) -> (kh*kw*C, N*H*W); K ordered (kh, kw, cin) to match wT."""
    c, n, h, w = x.shape
    if kh == 1 and kw == 1:
        return x.reshape(c, n * h * w)
    ph, pw = kh // 2, kw // 2
    xp = jnp.pad(x, ((0, 0), (0, 0), (ph, ph), (pw, pw)))
    taps = [xp[:, :, di:di + h, dj:dj + w] for di in range(kh) for dj in range(kw)]
    cols = jnp.stack(taps, axis=0)          # (kh*kw, C, N, H, W)
    return cols.reshape(kh * kw * c, n * h * w)


def conv_bn_pallas(p, x, relu, extras=()):
    """Fused Pallas conv: x (Cin,N,H,W) -> (Cout,N,H,W); extras (Cout,N,H,W)."""
    _, n, h, w = x.shape
    colsT = _im2colT(x, p["kh"], p["kw"])
    ex = tuple(e.reshape(e.shape[0], n * h * w) for e in extras)
    out = fused_convT(p["wT"], colsT, p["bias"], ex, relu)
    return out.reshape(-1, n, h, w)


def conv_bn_xla(p, x):
    """Tiny pooled-branch conv left to XLA (per perf review): x (Cin,N,Hs,Ws)."""
    _, n, h, w = x.shape
    colsT = _im2colT(x, p["kh"], p["kw"])
    out = jnp.dot(p["wT"], colsT, preferred_element_type=jnp.float32) + p["bias"][:, None]
    return out.reshape(-1, n, h, w)


def _adaptive_pool_matrix(in_size, out_size):
    P = np.zeros((out_size, in_size), np.float32)
    for i in range(out_size):
        start = (i * in_size) // out_size
        end = -(-((i + 1) * in_size) // out_size)   # ceil, PyTorch semantics
        P[i, start:end] = 1.0 / (end - start)
    return jnp.asarray(P)


def adaptive_avg_pool(x, out_h, out_w):
    _, _, h, w = x.shape
    Ph = _adaptive_pool_matrix(h, out_h)
    Pw = _adaptive_pool_matrix(w, out_w)
    x = jnp.einsum("oh,cnhw->cnow", Ph, x)
    x = jnp.einsum("pw,cnow->cnop", Pw, x)
    return x


def _bilinear_matrix(in_size, out_size):
    # align_corners=True (SPNet up_kwargs)
    M = np.zeros((out_size, in_size), np.float32)
    if in_size == 1:
        M[:, 0] = 1.0
        return jnp.asarray(M)
    for i in range(out_size):
        src = i * (in_size - 1) / (out_size - 1) if out_size > 1 else 0.0
        lo = int(np.floor(src))
        hi = min(lo + 1, in_size - 1)
        frac = src - lo
        M[i, lo] += 1.0 - frac
        M[i, hi] += frac
    return jnp.asarray(M)


def upsample_bilinear(x, out_h, out_w):
    _, _, h, w = x.shape
    Mh = _bilinear_matrix(h, out_h)
    Mw = _bilinear_matrix(w, out_w)
    x = jnp.einsum("oh,cnhw->cnow", Mh, x)
    x = jnp.einsum("pw,cnow->cnop", Mw, x)
    return x


# ----------------------------------------------------------------------------
# Parameters (deterministic, synthetic; BN folded into the weights / bias)
# ----------------------------------------------------------------------------
def init_conv_bn(key, cin, cout, kh, kw):
    k1, k2, k3, k4, k5 = jax.random.split(key, 5)
    fan_in = cin * kh * kw
    w = jax.random.normal(k1, (cout, kh, kw, cin), jnp.float32) / np.sqrt(fan_in)
    gamma = jax.random.uniform(k2, (cout,), jnp.float32, 0.5, 1.5)
    beta = jax.random.normal(k3, (cout,), jnp.float32) * 0.1
    mean = jax.random.normal(k4, (cout,), jnp.float32) * 0.1
    var = jax.random.uniform(k5, (cout,), jnp.float32, 0.5, 1.5)
    scale = gamma / jnp.sqrt(var + 1e-5)
    bias = beta - mean * scale
    # Fold BN scale into the weights (review item 4): epilogue keeps only +bias.
    wT = (w * scale[:, None, None, None]).reshape(cout, kh * kw * cin)
    return {"wT": wT, "bias": bias, "kh": kh, "kw": kw}


def init_strip_pooling(key, in_channels):
    inter = in_channels // 4
    kk = iter(jax.random.split(key, 12))
    c11 = init_conv_bn(next(kk), in_channels, inter, 1, 1)
    c12 = init_conv_bn(next(kk), in_channels, inter, 1, 1)
    return {
        # conv1_1 / conv1_2 share the same input -> one fused matmul (review 3a)
        "conv1_12": {"wT": jnp.concatenate([c11["wT"], c12["wT"]], axis=0),
                     "bias": jnp.concatenate([c11["bias"], c12["bias"]]),
                     "kh": 1, "kw": 1},
        "conv2_0": init_conv_bn(next(kk), inter, inter, 3, 3),
        "conv2_1": init_conv_bn(next(kk), inter, inter, 3, 3),
        "conv2_2": init_conv_bn(next(kk), inter, inter, 3, 3),
        "conv2_3": init_conv_bn(next(kk), inter, inter, 1, 3),
        "conv2_4": init_conv_bn(next(kk), inter, inter, 3, 1),
        "conv2_5": init_conv_bn(next(kk), inter, inter, 3, 3),
        "conv2_6": init_conv_bn(next(kk), inter, inter, 3, 3),
        "conv3": init_conv_bn(next(kk), inter * 2, in_channels, 1, 1),
        "inter": inter,
    }


def init_sphead(key, in_channels, out_channels):
    inter = in_channels // 2
    keys = jax.random.split(key, 6)
    params = {
        "trans": init_conv_bn(keys[0], in_channels, inter, 1, 1),
        "sp1": init_strip_pooling(keys[1], inter),
        "sp2": init_strip_pooling(keys[2], inter),
        "score1": init_conv_bn(keys[3], inter, inter // 2, 3, 3),
    }
    kf1, kf2 = jax.random.split(keys[4])
    wf = jax.random.normal(kf1, (out_channels, inter // 2), jnp.float32) / np.sqrt(inter // 2)
    bf = jax.random.normal(kf2, (out_channels,), jnp.float32) * 0.1
    # final 1x1 conv has a real bias and no BN
    params["score2"] = {"wT": wf, "bias": bf, "kh": 1, "kw": 1}
    return params


# ----------------------------------------------------------------------------
# Forward pass (mirrors SPHead / StripPooling; (C,N,H,W) layout internally)
# ----------------------------------------------------------------------------
def strip_pooling_forward(p, x, pool_sizes):
    _, n, h, w = x.shape
    inter = p["inter"]

    # fused conv1_1 + conv1_2 (one Pallas matmul with ReLU epilogue)
    x12 = conv_bn_pallas(p["conv1_12"], x, relu=True)
    x1, x2 = x12[:inter], x12[inter:]

    # pooled branches: tiny maps -> XLA glue (pool -> conv -> bilinear upsample)
    x2_2 = upsample_bilinear(conv_bn_xla(p["conv2_1"],
                             adaptive_avg_pool(x1, pool_sizes[0], pool_sizes[0])), h, w)
    x2_3 = upsample_bilinear(conv_bn_xla(p["conv2_2"],
                             adaptive_avg_pool(x1, pool_sizes[1], pool_sizes[1])), h, w)
    x2_4 = upsample_bilinear(conv_bn_xla(p["conv2_3"],
                             adaptive_avg_pool(x2, 1, w)), h, w)        # pool3: (1, None)
    x2_5 = upsample_bilinear(conv_bn_xla(p["conv2_4"],
                             adaptive_avg_pool(x2, h, 1)), h, w)        # pool4: (None, 1)

    # relu(conv2_0(x1) + x2_2 + x2_3): summands + ReLU fused in conv2_0 epilogue
    x1b_in = conv_bn_pallas(p["conv2_0"], x1, relu=True, extras=(x2_2, x2_3))
    x1b = conv_bn_pallas(p["conv2_5"], x1b_in, relu=True)

    x2b_in = jnp.maximum(x2_4 + x2_5, 0.0)     # XLA fuses this with the upsamples
    x2b = conv_bn_pallas(p["conv2_6"], x2b_in, relu=True)

    # relu(x + conv3(cat)): residual + ReLU fused in conv3 epilogue
    return conv_bn_pallas(p["conv3"], jnp.concatenate([x1b, x2b], axis=0),
                          relu=True, extras=(x,))


def sphead_forward(params, x_nchw):
    x = jnp.transpose(x_nchw, (1, 0, 2, 3))             # NCHW -> (C,N,H,W)
    x = conv_bn_pallas(params["trans"], x, relu=True)   # trans_layer
    x = strip_pooling_forward(params["sp1"], x, (20, 12))
    x = strip_pooling_forward(params["sp2"], x, (20, 12))
    x = conv_bn_pallas(params["score1"], x, relu=True)  # 3x3 conv + BN + ReLU
    # Dropout2d(0.1) -> identity at inference
    x = conv_bn_pallas(params["score2"], x, relu=False)  # final 1x1 conv (with bias)
    return jnp.transpose(x, (1, 0, 2, 3))                # (Cout,N,H,W) -> NCHW


# ----------------------------------------------------------------------------
if __name__ == "__main__":
    key = jax.random.PRNGKey(0)
    pkey, xkey = jax.random.split(key)

    in_channels, out_channels = 16, 5   # inter=8, strip-pooling inner channels=2
    N, H, W = 2, 16, 16

    params = init_sphead(pkey, in_channels, out_channels)
    x = jax.random.normal(xkey, (N, in_channels, H, W), jnp.float32)  # NCHW input

    fwd = jax.jit(lambda inp: sphead_forward(params, inp))
    y = fwd(x)
    jax.block_until_ready(y)

    assert y.shape == (N, out_channels, H, W), y.shape
    assert bool(jnp.all(jnp.isfinite(y)))
    print("KERNEL_OK")
</pallas_src>

<mosaic_0001>
module attributes {stable_mosaic.version = 11 : i64} {
  func.func @_convT_kernel(%arg0: memref<8x16xbf16, #tpu.memory_space<vmem>>, %arg1: memref<16x512xbf16, #tpu.memory_space<vmem>>, %arg2: memref<8x1xf32, #tpu.memory_space<vmem>>, %arg3: memref<8x512xf32, #tpu.memory_space<vmem>>) attributes {dimension_semantics = [], scalar_prefetch = 0 : i64, scratch_operands = 0 : i64, tpu.core_type = #tpu.core_type<tc>} {
    %c0 = arith.constant 0 : index
    %c0_0 = arith.constant 0 : index
    %0 = vector.load %arg0[%c0, %c0_0] : memref<8x16xbf16, #tpu.memory_space<vmem>>, vector<8x16xbf16>
    %c0_1 = arith.constant 0 : index
    %c0_2 = arith.constant 0 : index
    %1 = vector.load %arg1[%c0_1, %c0_2] : memref<16x512xbf16, #tpu.memory_space<vmem>>, vector<16x512xbf16>
    %cst = arith.constant dense<0.000000e+00> : vector<8x512xf32>
    %2 = tpu.matmul %0, %1, %cst {dimension_numbers = #tpu.dot_dimension_numbers<[1], [0], [0], [1], [0, 0, 1, 1], [], []>} : vector<8x16xbf16>, vector<16x512xbf16>, vector<8x512xf32> -> vector<8x512xf32>
    %c0_3 = arith.constant 0 : index
    %c0_4 = arith.constant 0 : index
    %3 = vector.load %arg2[%c0_3, %c0_4] : memref<8x1xf32, #tpu.memory_space<vmem>>, vector<8x1xf32>
    %4 = vector.broadcast %3 : vector<8x1xf32> to vector<8x512xf32>
    %5 = arith.addf %2, %4 : vector<8x512xf32>
    %cst_5 = arith.constant 0.000000e+00 : f32
    %6 = vector.broadcast %cst_5 : f32 to vector<8x512xf32>
    %7 = arith.maximumf %5, %6 : vector<8x512xf32>
    %c0_6 = arith.constant 0 : index
    %c0_7 = arith.constant 0 : index
    %8 = vector.load %arg3[%c0_6, %c0_7] : memref<8x512xf32, #tpu.memory_space<vmem>>, vector<8x512xf32>
    tpu.vector_store %arg3[%c0_6, %c0_7], %7 {strides = array<i32>} : memref<8x512xf32, #tpu.memory_space<vmem>>, vector<8x512xf32>,
    return
  }
}

module attributes {stable_mosaic.version = 11 : i64} {
  func.func @_convT_kernel(%arg0: memref<4x8xbf16, #tpu.memory_space<vmem>>, %arg1: memref<8x512xbf16, #tpu.memory_space<vmem>>, %arg2: memref<4x1xf32, #tpu.memory_space<vmem>>, %arg3: memref<4x512xf32, #tpu.memory_space<vmem>>) attributes {dimension_semantics = [], scalar_prefetch = 0 : i64, scratch_operands = 0 : i64, tpu.core_type = #tpu.core_type<tc>} {
    %c0 = arith.constant 0 : index
    %c0_0 = arith.constant 0 : index
    %0 = vector.load %arg0[%c0, %c0_0] : memref<4x8xbf16, #tpu.memory_space<vmem>>, vector<4x8xbf16>
    %c0_1 = arith.constant 0 : index
    %c0_2 = arith.constant 0 : index
    %1 = vector.load %arg1[%c0_1, %c0_2] : memref<8x512xbf16, #tpu.memory_space<vmem>>, vector<8x512xbf16>
    %cst = arith.constant dense<0.000000e+00> : vector<4x512xf32>
    %2 = tpu.matmul %0, %1, %cst {dimension_numbers = #tpu.dot_dimension_numbers<[1], [0], [0], [1], [0, 0, 1, 1], [], []>} : vector<4x8xbf16>, vector<8x512xbf16>, vector<4x512xf32> -> vector<4x512xf32>
    %c0_3 = arith.constant 0 : index
    %c0_4 = arith.constant 0 : index
    %3 = vector.load %arg2[%c0_3, %c0_4] : memref<4x1xf32, #tpu.memory_space<vmem>>, vector<4x1xf32>
    %4 = vector.broadcast %3 : vector<4x1xf32> to vector<4x512xf32>
    %5 = arith.addf %2, %4 : vector<4x512xf32>
    %cst_5 = arith.constant 0.000000e+00 : f32
    %6 = vector.broadcast %cst_5 : f32 to vector<4x512xf32>
    %7 = arith.maximumf %5, %6 : vector<4x512xf32>
    %c0_6 = arith.constant 0 : index
    %c0_7 = arith.constant 0 : index
    %8 = vector.load %arg3[%c0_6, %c0_7] : memref<4x512xf32, #tpu.memory_space<vmem>>, vector<4x512xf32>
    tpu.vector_store %arg3[%c0_6, %c0_7], %7 {strides = array<i32>} : memref<4x512xf32, #tpu.memory_space<vmem>>, vector<4x512xf32>,
    return
  }
}

module attributes {stable_mosaic.version = 11 : i64} {
  func.func @_convT_kernel(%arg0: memref<2x18xbf16, #tpu.memory_space<vmem>>, %arg1: memref<18x512xbf16, #tpu.memory_space<vmem>>, %arg2: memref<2x1xf32, #tpu.memory_space<vmem>>, %arg3: memref<2x512xf32, #tpu.memory_space<vmem>>) attributes {dimension_semantics = [], scalar_prefetch = 0 : i64, scratch_operands = 0 : i64, tpu.core_type = #tpu.core_type<tc>} {
    %c0 = arith.constant 0 : index
    %c0_0 = arith.constant 0 : index
    %0 = vector.load %arg0[%c0, %c0_0] : memref<2x18xbf16, #tpu.memory_space<vmem>>, vector<2x18xbf16>
    %c0_1 = arith.constant 0 : index
    %c0_2 = arith.constant 0 : index
    %1 = vector.load %arg1[%c0_1, %c0_2] : memref<18x512xbf16, #tpu.memory_space<vmem>>, vector<18x512xbf16>
    %cst = arith.constant dense<0.000000e+00> : vector<2x512xf32>
    %2 = tpu.matmul %0, %1, %cst {dimension_numbers = #tpu.dot_dimension_numbers<[1], [0], [0], [1], [0, 0, 1, 1], [], []>} : vector<2x18xbf16>, vector<18x512xbf16>, vector<2x512xf32> -> vector<2x512xf32>
    %c0_3 = arith.constant 0 : index
    %c0_4 = arith.constant 0 : index
    %3 = vector.load %arg2[%c0_3, %c0_4] : memref<2x1xf32, #tpu.memory_space<vmem>>, vector<2x1xf32>
    %4 = vector.broadcast %3 : vector<2x1xf32> to vector<2x512xf32>
    %5 = arith.addf %2, %4 : vector<2x512xf32>
    %cst_5 = arith.constant 0.000000e+00 : f32
    %6 = vector.broadcast %cst_5 : f32 to vector<2x512xf32>
    %7 = arith.maximumf %5, %6 : vector<2x512xf32>
    %c0_6 = arith.constant 0 : index
    %c0_7 = arith.constant 0 : index
    %8 = vector.load %arg3[%c0_6, %c0_7] : memref<2x512xf32, #tpu.memory_space<vmem>>, vector<2x512xf32>
    tpu.vector_store %arg3[%c0_6, %c0_7], %7 {strides = array<i32>} : memref<2x512xf32, #tpu.memory_space<vmem>>, vector<2x512xf32>,
    return
  }
}

module attributes {stable_mosaic.version = 11 : i64} {
  func.func @_convT_kernel(%arg0: memref<2x18xbf16, #tpu.memory_space<vmem>>, %arg1: memref<18x512xbf16, #tpu.memory_space<vmem>>, %arg2: memref<2x1xf32, #tpu.memory_space<vmem>>, %arg3: memref<2x512xf32, #tpu.memory_space<vmem>>, %arg4: memref<2x512xf32, #tpu.memory_space<vmem>>, %arg5: memref<2x512xf32, #tpu.memory_space<vmem>>) attributes {dimension_semantics = [], scalar_prefetch = 0 : i64, scratch_operands = 0 : i64, tpu.core_type = #tpu.core_type<tc>} {
    %c0 = arith.constant 0 : index
    %c0_0 = arith.constant 0 : index
    %0 = vector.load %arg0[%c0, %c0_0] : memref<2x18xbf16, #tpu.memory_space<vmem>>, vector<2x18xbf16>
    %c0_1 = arith.constant 0 : index
    %c0_2 = arith.constant 0 : index
    %1 = vector.load %arg1[%c0_1, %c0_2] : memref<18x512xbf16, #tpu.memory_space<vmem>>, vector<18x512xbf16>
    %cst = arith.constant dense<0.000000e+00> : vector<2x512xf32>
    %2 = tpu.matmul %0, %1, %cst {dimension_numbers = #tpu.dot_dimension_numbers<[1], [0], [0], [1], [0, 0, 1, 1], [], []>} : vector<2x18xbf16>, vector<18x512xbf16>, vector<2x512xf32> -> vector<2x512xf32>
    %c0_3 = arith.constant 0 : index
    %c0_4 = arith.constant 0 : index
    %3 = vector.load %arg2[%c0_3, %c0_4] : memref<2x1xf32, #tpu.memory_space<vmem>>, vector<2x1xf32>
    %4 = vector.broadcast %3 : vector<2x1xf32> to vector<2x512xf32>
    %5 = arith.addf %2, %4 : vector<2x512xf32>
    %c0_5 = arith.constant 0 : index
    %c0_6 = arith.constant 0 : index
    %6 = vector.load %arg3[%c0_5, %c0_6] : memref<2x512xf32, #tpu.memory_space<vmem>>, vector<2x512xf32>
    %7 = arith.addf %5, %6 : vector<2x512xf32>
    %c0_7 = arith.constant 0 : index
    %c0_8 = arith.constant 0 : index
    %8 = vector.load %arg4[%c0_7, %c0_8] : memref<2x512xf32, #tpu.memory_space<vmem>>, vector<2x512xf32>
    %9 = arith.addf %7, %8 : vector<2x512xf32>
    %cst_9 = arith.constant 0.000000e+00 : f32
    %10 = vector.broadcast %cst_9 : f32 to vector<2x512xf32>
    %11 = arith.maximumf %9, %10 : vector<2x512xf32>
    %c0_10 = arith.constant 0 : index
    %c0_11 = arith.constant 0 : index
    %12 = vector.load %arg5[%c0_10, %c0_11] : memref<2x512xf32, #tpu.memory_space<vmem>>, vector<2x512xf32>
    tpu.vector_store %arg5[%c0_10, %c0_11], %11 {strides = array<i32>} : memref<2x512xf32, #tpu.memory_space<vmem>>, vector<2x512xf32>,
    return
  }
}

module attributes {stable_mosaic.version = 11 : i64} {
  func.func @_convT_kernel(%arg0: memref<8x4xbf16, #tpu.memory_space<vmem>>, %arg1: memref<4x512xbf16, #tpu.memory_space<vmem>>, %arg2: memref<8x1xf32, #tpu.memory_space<vmem>>, %arg3: memref<8x512xf32, #tpu.memory_space<vmem>>, %arg4: memref<8x512xf32, #tpu.memory_space<vmem>>) attributes {dimension_semantics = [], scalar_prefetch = 0 : i64, scratch_operands = 0 : i64, tpu.core_type = #tpu.core_type<tc>} {
    %c0 = arith.constant 0 : index
    %c0_0 = arith.constant 0 : index
    %0 = vector.load %arg0[%c0, %c0_0] : memref<8x4xbf16, #tpu.memory_space<vmem>>, vector<8x4xbf16>
    %c0_1 = arith.constant 0 : index
    %c0_2 = arith.constant 0 : index
    %1 = vector.load %arg1[%c0_1, %c0_2] : memref<4x512xbf16, #tpu.memory_space<vmem>>, vector<4x512xbf16>
    %cst = arith.constant dense<0.000000e+00> : vector<8x512xf32>
    %2 = tpu.matmul %0, %1, %cst {dimension_numbers = #tpu.dot_dimension_numbers<[1], [0], [0], [1], [0, 0, 1, 1], [], []>} : vector<8x4xbf16>, vector<4x512xbf16>, vector<8x512xf32> -> vector<8x512xf32>
    %c0_3 = arith.constant 0 : index
    %c0_4 = arith.constant 0 : index
    %3 = vector.load %arg2[%c0_3, %c0_4] : memref<8x1xf32, #tpu.memory_space<vmem>>, vector<8x1xf32>
    %4 = vector.broadcast %3 : vector<8x1xf32> to vector<8x512xf32>
    %5 = arith.addf %2, %4 : vector<8x512xf32>
    %c0_5 = arith.constant 0 : index
    %c0_6 = arith.constant 0 : index
    %6 = vector.load %arg3[%c0_5, %c0_6] : memref<8x512xf32, #tpu.memory_space<vmem>>, vector<8x512xf32>
    %7 = arith.addf %5, %6 : vector<8x512xf32>
    %cst_7 = arith.constant 0.000000e+00 : f32
    %8 = vector.broadcast %cst_7 : f32 to vector<8x512xf32>
    %9 = arith.maximumf %7, %8 : vector<8x512xf32>
    %c0_8 = arith.constant 0 : index
    %c0_9 = arith.constant 0 : index
    %10 = vector.load %arg4[%c0_8, %c0_9] : memref<8x512xf32, #tpu.memory_space<vmem>>, vector<8x512xf32>
    tpu.vector_store %arg4[%c0_8, %c0_9], %9 {strides = array<i32>} : memref<8x512xf32, #tpu.memory_space<vmem>>, vector<8x512xf32>,
    return
  }
}

module attributes {stable_mosaic.version = 11 : i64} {
  func.func @_convT_kernel(%arg0: memref<4x72xbf16, #tpu.memory_space<vmem>>, %arg1: memref<72x512xbf16, #tpu.memory_space<vmem>>, %arg2: memref<4x1xf32, #tpu.memory_space<vmem>>, %arg3: memref<4x512xf32, #tpu.memory_space<vmem>>) attributes {dimension_semantics = [], scalar_prefetch = 0 : i64, scratch_operands = 0 : i64, tpu.core_type = #tpu.core_type<tc>} {
    %c0 = arith.constant 0 : index
    %c0_0 = arith.constant 0 : index
    %0 = vector.load %arg0[%c0, %c0_0] : memref<4x72xbf16, #tpu.memory_space<vmem>>, vector<4x72xbf16>
    %c0_1 = arith.constant 0 : index
    %c0_2 = arith.constant 0 : index
    %1 = vector.load %arg1[%c0_1, %c0_2] : memref<72x512xbf16, #tpu.memory_space<vmem>>, vector<72x512xbf16>
    %cst = arith.constant dense<0.000000e+00> : vector<4x512xf32>
    %2 = tpu.matmul %0, %1, %cst {dimension_numbers = #tpu.dot_dimension_numbers<[1], [0], [0], [1], [0, 0, 1, 1], [], []>} : vector<4x72xbf16>, vector<72x512xbf16>, vector<4x512xf32> -> vector<4x512xf32>
    %c0_3 = arith.constant 0 : index
    %c0_4 = arith.constant 0 : index
    %3 = vector.load %arg2[%c0_3, %c0_4] : memref<4x1xf32, #tpu.memory_space<vmem>>, vector<4x1xf32>
    %4 = vector.broadcast %3 : vector<4x1xf32> to vector<4x512xf32>
    %5 = arith.addf %2, %4 : vector<4x512xf32>
    %cst_5 = arith.constant 0.000000e+00 : f32
    %6 = vector.broadcast %cst_5 : f32 to vector<4x512xf32>
    %7 = arith.maximumf %5, %6 : vector<4x512xf32>
    %c0_6 = arith.constant 0 : index
    %c0_7 = arith.constant 0 : index
    %8 = vector.load %arg3[%c0_6, %c0_7] : memref<4x512xf32, #tpu.memory_space<vmem>>, vector<4x512xf32>
    tpu.vector_store %arg3[%c0_6, %c0_7], %7 {strides = array<i32>} : memref<4x512xf32, #tpu.memory_space<vmem>>, vector<4x512xf32>,
    return
  }
}

module attributes {stable_mosaic.version = 11 : i64} {
  func.func @_convT_kernel(%arg0: memref<5x4xbf16, #tpu.memory_space<vmem>>, %arg1: memref<4x512xbf16, #tpu.memory_space<vmem>>, %arg2: memref<5x1xf32, #tpu.memory_space<vmem>>, %arg3: memref<5x512xf32, #tpu.memory_space<vmem>>) attributes {dimension_semantics = [], scalar_prefetch = 0 : i64, scratch_operands = 0 : i64, tpu.core_type = #tpu.core_type<tc>} {
    %c0 = arith.constant 0 : index
    %c0_0 = arith.constant 0 : index
    %0 = vector.load %arg0[%c0, %c0_0] : memref<5x4xbf16, #tpu.memory_space<vmem>>, vector<5x4xbf16>
    %c0_1 = arith.constant 0 : index
    %c0_2 = arith.constant 0 : index
    %1 = vector.load %arg1[%c0_1, %c0_2] : memref<4x512xbf16, #tpu.memory_space<vmem>>, vector<4x512xbf16>
    %cst = arith.constant dense<0.000000e+00> : vector<5x512xf32>
    %2 = tpu.matmul %0, %1, %cst {dimension_numbers = #tpu.dot_dimension_numbers<[1], [0], [0], [1], [0, 0, 1, 1], [], []>} : vector<5x4xbf16>, vector<4x512xbf16>, vector<5x512xf32> -> vector<5x512xf32>
    %c0_3 = arith.constant 0 : index
    %c0_4 = arith.constant 0 : index
    %3 = vector.load %arg2[%c0_3, %c0_4] : memref<5x1xf32, #tpu.memory_space<vmem>>, vector<5x1xf32>
    %4 = vector.broadcast %3 : vector<5x1xf32> to vector<5x512xf32>
    %5 = arith.addf %2, %4 : vector<5x512xf32>
    %c0_5 = arith.constant 0 : index
    %c0_6 = arith.constant 0 : index
    %6 = vector.load %arg3[%c0_5, %c0_6] : memref<5x512xf32, #tpu.memory_space<vmem>>, vector<5x512xf32>
    tpu.vector_store %arg3[%c0_5, %c0_6], %5 {strides = array<i32>} : memref<5x512xf32, #tpu.memory_space<vmem>>, vector<5x512xf32>,
    return
  }
}

</mosaic_0001>

<bundles_post_ra>
// kernel: _lambda_.13
= control target key start
LH: loop header
LB: loop body
LE: loop exit
PB: predicated region body
PF: predicated region fallthrough
CT: control target
= control target key end

     0   :  { %v158_v1 = vmov 0   ;;  %vm46_vm0 = vcmask 130048   ;;  %s209_s1 = inlined_call_operand.vmem [shape: bf16[16,512], index: 1, kind: input, shape index: {}]   ;;  %s210_s2 = inlined_call_operand.vmem [shape: f32[8,1], index: 2, kind: input, shape index: {}]   ;;  %s211_s0 = inlined_call_operand.vmem [shape: bf16[8,16], index: 0, kind: input, shape index: {}]   ;;  %s212_s3 = inlined_call_operand.vmem [shape: f32[8,512], index: 3, kind: output, shape index: {}]  }
   0x1   :  { %v152_v0 = vld [vmem:[%s209_s1 + $0x4] ss:$16 sps:$4 sm:$0xff]   ;;  %82 = vmatprep.mubr.bf16.mxu0 %v158_v1  ;;  %123 = vmatprep.mubr.bf16.mxu1 %v158_v1  ;;  %v154_v2 = vld [vmem:[%s209_s1 + $0xc] ss:$16 sps:$4 sm:$0xff]   ;;  %v156_v3 = vld [vmem:[%s209_s1] ss:$16 sps:$4 sm:$0xff]  }
   0x2   :  { %151 = vset.pattern.permute.xlu0 %v158_v1  ;;  %50 = vmatprep.subr.bf16.mxu0 %v152_v0  ;;  %v157_v4 = vld [vmem:[%s209_s1 + $0x8] ss:$16 sps:$4 sm:$0xff]   ;;  %v20_v5 = vld [vmem:[%s210_s2] sm:$0xff] }
   0x3   :  { %91 = vmatprep.subr.bf16.mxu1 %v154_v2  ;;  %51 = vmatpush1.bf16.msra.mxu0 %v156_v3  ;;  %v15_v6 = vld [vmem:[%s211_s0] sm:$0xf] }
   0x4   :  { %92 = vmatpush1.bf16.msra.mxu1 %v157_v4  ;;  %23 = vperm.xlu0 %151, %v20_v5  }
   0x6   :  { %148 = vmatmul.mubr.msk.bf16.vlgmr.msra.gmra.mrb[0].mxu0 %vm46_vm0, %v15_v6 }
   0x7   :  { %149 = vmatmul.mubr.msk.bf16.vlgmr.msra.gmra.mrb[0].mxu1 %vm46_vm0, %v15_v6 }
  0x83   :  { %v24_v7 = vpop.permute.xlu0 %23 }
  0xd9   :  { %v84_v8 = vpop.f32.mrb[0].mxu0 }
  0xda   :  { %v125_v9 = vpop.f32.mrb[0].mxu1  ;;  %v85_v10 = vadd.f32 %v84_v8, %v24_v7  ;;  %v86_v12 = vpop.f32.mrb[1].mxu0 }
  0xdb   :  { %v126_v11 = vadd.f32 %v125_v9, %v24_v7  ;;  %v127_v13 = vpop.f32.mrb[1].mxu1  ;;  %v87_v14 = vadd.f32 %v86_v12, %v24_v7  ;;  %v88_v16 = vpop.f32.mrb[2].mxu0 }
  0xdc   :  { %v128_v15 = vadd.f32 %v127_v13, %v24_v7  ;;  %v129_v17 = vpop.f32.mrb[2].mxu1  ;;  %v132_v18 = vmax.f32 %v85_v10, 0.0  ;;  %v89_v20 = vpop.f32.mrb[3].mxu0 }
  0xdd   :  { %v134_v19 = vmax.f32 %v126_v11, 0.0  ;;  %v130_v21 = vpop.f32.mrb[3].mxu1  ;;  %v133_v22 = vmax.f32 %v87_v14, 0.0 }
  0xde   :  { %v135_v23 = vmax.f32 %v128_v15, 0.0  ;;  %136 = vst [vmem:[%s212_s3] sm:$0xff] %v132_v18 }
  0xdf   :  { %138 = vst [vmem:[%s212_s3 + $0x10] sm:$0xff] %v134_v19  ;;  %137 = vst [vmem:[%s212_s3 + $0x8] sm:$0xff] %v133_v22 }
  0xe0   :  { %139 = vst [vmem:[%s212_s3 + $0x18] sm:$0xff] %v135_v23 }

// kernel: _lambda_.14
= control target key start
LH: loop header
LB: loop body
LE: loop exit
PB: predicated region body
PF: predicated region fallthrough
CT: control target
= control target key end

     0   :  { %vm38_vm0 = vcmask 1043456   ;;  %v165_v2 = vmov 0   ;;  %vm34_vm1 = vcmask 64512   ;;  %s208_s1 = inlined_call_operand.vmem [shape: bf16[8,512], index: 1, kind: input, shape index: {}]   ;;  %s209_s2 = inlined_call_operand.vmem [shape: f32[4,1], index: 2, kind: input, shape index: {}]   ;;  %s210_s0 = inlined_call_operand.vmem [shape: bf16[4,8], index: 0, kind: input, shape index: {}]   ;;  %s211_s3 = inlined_call_operand.vmem [shape: f32[4,512], index: 3, kind: output, shape index: {}]  }
   0x1   :  { %v16_v0 = vld [vmem:[%s208_s1] sm:$0xff]  ;;  %v17_v1 = vld [vmem:[%s208_s1 + $0x8] sm:$0xff]  ;;  %83 = vmatprep.mubr.bf16.mxu0 %v165_v2  ;;  %124 = vmatprep.mubr.bf16.mxu1 %v165_v2 }
   0x2   :  { %v152_v3 = vcombine.high %v16_v0, %v16_v0  ;;  %v154_v4 = vcombine.high %v17_v1, %v17_v1  ;;  %v151_v5 = vcombine.low %v16_v0, %v16_v0  ;;  %v153_v6 = vcombine.low %v17_v1, %v17_v1  ;;  %160 = vset.pattern.permute.xlu0 %v165_v2  ;;  %v18_v7 = vld [vmem:[%s209_s2] sm:$0xf] }
   0x3   :  { %21 = vperm.xlu0 %160, %v18_v7   ;;  %v15_v10 = vld [vmem:[%s210_s0] sm:$0x3] }
   0x4   :  { %155 = vmatprep.subr.msk.bf16.mxu0 %vm38_vm0, %v152_v3  ;;  %157 = vmatprep.subr.msk.bf16.mxu1 %vm38_vm0, %v154_v4  ;;  %v40_v8 = vsel %vm38_vm0, %v151_v5, 0  ;;  %v46_v9 = vsel %vm38_vm0, %v153_v6, 0 }
   0x5   :  { %52 = vmatpush1.bf16.msra.mxu0 %v40_v8  ;;  %93 = vmatpush1.bf16.msra.mxu1 %v46_v9 }
   0x8   :  { %156 = vmatmul.mubr.msk.bf16.vlgmr.msra.gmra.mrb[0].mxu0 %vm34_vm1, %v15_v10  ;;  %158 = vmatmul.mubr.msk.bf16.vlgmr.msra.gmra.mrb[0].mxu1 %vm34_vm1, %v15_v10 }
  0x82   :  { %v22_v11 = vpop.permute.xlu0 %21 }
  0xdb   :  { %v85_v12 = vpop.f32.mrb[0].mxu0  ;;  %v126_v13 = vpop.f32.mrb[0].mxu1 }
  0xdc   :  { %v86_v14 = vadd.f32 %v85_v12, %v22_v11  ;;  %v127_v15 = vadd.f32 %v126_v13, %v22_v11  ;;  %v87_v16 = vpop.f32.mrb[1].mxu0  ;;  %v128_v17 = vpop.f32.mrb[1].mxu1 }
  0xdd   :  { %v88_v18 = vadd.f32 %v87_v16, %v22_v11  ;;  %v129_v19 = vadd.f32 %v128_v17, %v22_v11  ;;  %v89_v20 = vpop.f32.mrb[2].mxu0  ;;  %v130_v21 = vpop.f32.mrb[2].mxu1 }
  0xde   :  { %v133_v22 = vmax.f32 %v86_v14, 0.0  ;;  %v135_v23 = vmax.f32 %v127_v15, 0.0  ;;  %v90_v24 = vpop.f32.mrb[3].mxu0  ;;  %v131_v25 = vpop.f32.mrb[3].mxu1 }
  0xdf   :  { %v134_v26 = vmax.f32 %v88_v18, 0.0  ;;  %v136_v27 = vmax.f32 %v129_v19, 0.0 }
  0xe1   :  { %v141_v28 = vcombine.low %v133_v22, %v134_v26  ;;  %v142_v29 = vcombine.low %v135_v23, %v136_v27 }
  0xe3   :  { %145 = vst [vmem:[%s211_s3] sm:$0xff] %v141_v28  ;;  %146 = vst [vmem:[%s211_s3 + $0x8] sm:$0xff] %v142_v29 }

// kernel: _lambda_.17
= control target key start
LH: loop header
LB: loop body
LE: loop exit
PB: predicated region body
PF: predicated region fallthrough
CT: control target
= control target key end

     0   :  { %v213_v1 = vmov 0   ;;  %vm62_vm0 = vcmask 1040384   ;;  %vm58_vm1 = vcmask 146432   ;;  %v214_v15 = vmov 1983009808   ;;  %s266_s1 = inlined_call_operand.vmem [shape: bf16[18,512], index: 1, kind: input, shape index: {}]   ;;  %s267_s2 = inlined_call_operand.vmem [shape: f32[2,1], index: 2, kind: input, shape index: {}]   ;;  %s268_s0 = inlined_call_operand.vmem [shape: bf16[2,18], index: 0, kind: input, shape index: {}]   ;;  %s269_s3 = inlined_call_operand.vmem [shape: f32[2,512], index: 3, kind: output, shape index: {}]  }
   0x1   :  { %v203_v0 = vld [vmem:[%s266_s1 + $0x4] ss:$16 sps:$4 sm:$0xff]   ;;  %107 = vmatprep.mubr.bf16.mxu0 %v213_v1  ;;  %148 = vmatprep.mubr.bf16.mxu1 %v213_v1  ;;  %v205_v2 = vld [vmem:[%s266_s1 + $0xc] ss:$16 sps:$4 sm:$0xff]   ;;  %v207_v3 = vld [vmem:[%s266_s1] ss:$16 sps:$4 sm:$0xff]   ;;  %v168_v16 = vunpack.c.l.s4 %v214_v15  ;;  %v170_v17 = vlaneseq }
   0x2   :  { %202 = vset.pattern.permute.xlu0 %v213_v1  ;;  %75 = vmatprep.subr.bf16.mxu0 %v203_v0  ;;  %v208_v4 = vld [vmem:[%s266_s1 + $0x8] ss:$16 sps:$4 sm:$0xff]   ;;  %v20_v5 = vld [vmem:[%s266_s1 + $0x20] sm:$0x11] }
   0x3   :  { %116 = vmatprep.subr.bf16.mxu1 %v205_v2  ;;  %v193_v6 = vcombine.high %v20_v5, %v20_v5  ;;  %v21_v7 = vld [vmem:[%s266_s1 + $0x28] sm:$0x11]  ;;  %v192_v8 = vcombine.low %v20_v5, %v20_v5  ;;  %v22_v9 = vld [vmem:[%s267_s2] sm:$0x3]  ;;  %76 = vmatpush1.bf16.msra.mxu0 %v207_v3  ;;  %v169_v21 = vunpack.c.0.s8 %v168_v16  ;;  %v171_v22 = vshrl.u32 %v170_v17, 7 }
   0x4   :  { %117 = vmatpush1.bf16.msra.mxu1 %v208_v4  ;;  %v195_v10 = vcombine.high %v21_v7, %v21_v7  ;;  %v194_v11 = vcombine.low %v21_v7, %v21_v7  ;;  %25 = vperm.xlu0 %202, %v22_v9   ;;  %v15_v14 = vld [vmem:[%s268_s0] sm:$0x1] }
   0x5   :  { %196 = vmatprep.subr.msk.bf16.mxu0 %vm62_vm0, %v193_v6  ;;  %v64_v12 = vsel %vm62_vm0, %v192_v8, 0  ;;  %v172_v36 = vsub.s32 %v169_v21, %v171_v22 }
   0x6   :  { %198 = vmatprep.subr.msk.bf16.mxu1 %vm62_vm0, %v195_v10  ;;  %v70_v13 = vsel %vm62_vm0, %v194_v11, 0 }
   0x7   :  { %78 = vmatpush1.bf16.msra.mxu0 %v64_v12 }
   0x8   :  { %119 = vmatpush1.bf16.msra.mxu1 %v70_v13 }
   0xa   :  { %197 = vmatmul.mubr.msk.bf16.vlgmr.msra.gmra.mrb[0].mxu0 %vm58_vm1, %v15_v14 }
   0xb   :  { %199 = vmatmul.mubr.msk.bf16.vlgmr.msra.gmra.mrb[0].mxu1 %vm58_vm1, %v15_v14 }
  0x83   :  { %v26_v18 = vpop.permute.xlu0 %25 }
  0xdd   :  { %v109_v19 = vpop.f32.mrb[0].mxu0 }
  0xde   :  { %v150_v20 = vpop.f32.mrb[0].mxu1  ;;  %v110_v23 = vadd.f32 %v109_v19, %v26_v18  ;;  %v111_v25 = vpop.f32.mrb[1].mxu0 }
  0xdf   :  { %v151_v24 = vadd.f32 %v150_v20, %v26_v18  ;;  %v152_v26 = vpop.f32.mrb[1].mxu1  ;;  %v112_v27 = vadd.f32 %v111_v25, %v26_v18  ;;  %v113_v29 = vpop.f32.mrb[2].mxu0 }
  0xe0   :  { %v153_v28 = vadd.f32 %v152_v26, %v26_v18  ;;  %v154_v30 = vpop.f32.mrb[2].mxu1  ;;  %v157_v31 = vmax.f32 %v110_v23, 0.0  ;;  %v114_v33 = vpop.f32.mrb[3].mxu0 }
  0xe1   :  { %v159_v32 = vmax.f32 %v151_v24, 0.0  ;;  %v155_v34 = vpop.f32.mrb[3].mxu1  ;;  %v158_v35 = vmax.f32 %v112_v27, 0.0 }
  0xe2   :  { %v160_v37 = vmax.f32 %v153_v28, 0.0 }
  0xe3   :  { %v165_v38 = vcombine.low %v157_v31, %v158_v35 }
  0xe4   :  { %v166_v39 = vcombine.low %v159_v32, %v160_v37 }
  0xe5   :  { %v173_v40 = vrot.slane %v165_v38, %v172_v36 }
  0xe6   :  { %v180_v41 = vrot.slane %v166_v39, %v172_v36 }
  0xe8   :  { %v181_v42 = vcombine.low %v173_v40, %v180_v41 }
  0xea   :  { %183 = vst [vmem:[%s269_s3] sm:$0xff] %v181_v42 }

// kernel: _lambda_.15
= control target key start
LH: loop header
LB: loop body
LE: loop exit
PB: predicated region body
PF: predicated region fallthrough
CT: control target
= control target key end

     0   :  { %v275_v1 = vmov 0   ;;  %vm68_vm0 = vcmask 1040384   ;;  %vm64_vm1 = vcmask 146432   ;;  %v276_v15 = vmov 1983009808   ;;  %s344_s1 = inlined_call_operand.vmem [shape: bf16[18,512], index: 1, kind: input, shape index: {}]   ;;  %s345_s2 = inlined_call_operand.vmem [shape: f32[2,1], index: 2, kind: input, shape index: {}]   ;;  %s346_s0 = inlined_call_operand.vmem [shape: bf16[2,18], index: 0, kind: input, shape index: {}]   ;;  %s347_s3 = inlined_call_operand.vmem [shape: f32[2,512], index: 3, kind: input, shape index: {}]   ;;  %s348_s4 = inlined_call_operand.vmem [shape: f32[2,512], index: 4, kind: input, shape index: {}]   ;;  %s349_s5 = inlined_call_operand.vmem [shape: f32[2,512], index: 5, kind: output, shape index: {}]  }
   0x1   :  { %v263_v0 = vld [vmem:[%s344_s1 + $0x4] ss:$16 sps:$4 sm:$0xff]   ;;  %113 = vmatprep.mubr.bf16.mxu0 %v275_v1  ;;  %154 = vmatprep.mubr.bf16.mxu1 %v275_v1  ;;  %v265_v2 = vld [vmem:[%s344_s1 + $0xc] ss:$16 sps:$4 sm:$0xff]   ;;  %v267_v3 = vld [vmem:[%s344_s1] ss:$16 sps:$4 sm:$0xff]   ;;  %v167_v16 = vunpack.c.l.s4 %v276_v15  ;;  %v169_v17 = vlaneseq }
   0x2   :  { %262 = vset.pattern.permute.xlu0 %v275_v1  ;;  %81 = vmatprep.subr.bf16.mxu0 %v263_v0  ;;  %v268_v4 = vld [vmem:[%s344_s1 + $0x8] ss:$16 sps:$4 sm:$0xff]   ;;  %v26_v5 = vld [vmem:[%s344_s1 + $0x20] sm:$0x11] }
   0x3   :  { %122 = vmatprep.subr.bf16.mxu1 %v265_v2  ;;  %v253_v6 = vcombine.high %v26_v5, %v26_v5  ;;  %v27_v7 = vld [vmem:[%s344_s1 + $0x28] sm:$0x11]  ;;  %v252_v8 = vcombine.low %v26_v5, %v26_v5  ;;  %v28_v9 = vld [vmem:[%s345_s2] sm:$0x3]  ;;  %82 = vmatpush1.bf16.msra.mxu0 %v267_v3  ;;  %v168_v18 = vunpack.c.0.s8 %v167_v16  ;;  %v170_v19 = vshrl.u32 %v169_v17, 7 }
   0x4   :  { %123 = vmatpush1.bf16.msra.mxu1 %v268_v4  ;;  %v255_v10 = vcombine.high %v27_v7, %v27_v7  ;;  %v254_v11 = vcombine.low %v27_v7, %v27_v7  ;;  %31 = vperm.xlu0 %262, %v28_v9   ;;  %v21_v14 = vld [vmem:[%s346_s0] sm:$0x1] }
   0x5   :  { %256 = vmatprep.subr.msk.bf16.mxu0 %vm68_vm0, %v253_v6  ;;  %v70_v12 = vsel %vm68_vm0, %v252_v8, 0  ;;  %v163_v20 = vld [vmem:[%s347_s3] sm:$0xff]  ;;  %v171_v22 = vsub.s32 %v168_v18, %v170_v19 }
   0x6   :  { %258 = vmatprep.subr.msk.bf16.mxu1 %vm68_vm0, %v255_v10  ;;  %v76_v13 = vsel %vm68_vm0, %v254_v11, 0  ;;  %v190_v21 = vld [vmem:[%s348_s4] sm:$0xff]  ;;  %v165_v23 = vcombine.high %v163_v20, %v163_v20 }
   0x7   :  { %84 = vmatpush1.bf16.msra.mxu0 %v70_v12  ;;  %v192_v24 = vcombine.high %v190_v21, %v190_v21  ;;  %v172_v25 = vrot.slane %v163_v20, %v171_v22  ;;  %v199_v28 = vrot.slane %v190_v21, %v171_v22 }
   0x8   :  { %125 = vmatpush1.bf16.msra.mxu1 %v76_v13  ;;  %v179_v26 = vrot.slane %v165_v23, %v171_v22 }
   0x9   :  { %v206_v29 = vrot.slane %v192_v24, %v171_v22  ;;  %v180_v32 = vcombine.high %v172_v25, %v172_v25  ;;  %v207_v39 = vcombine.high %v199_v28, %v199_v28 }
   0xa   :  { %257 = vmatmul.mubr.msk.bf16.vlgmr.msra.gmra.mrb[0].mxu0 %vm64_vm1, %v21_v14  ;;  %v181_v33 = vcombine.high %v179_v26, %v179_v26 }
   0xb   :  { %259 = vmatmul.mubr.msk.bf16.vlgmr.msra.gmra.mrb[0].mxu1 %vm64_vm1, %v21_v14  ;;  %v208_v41 = vcombine.high %v206_v29, %v206_v29 }
  0x83   :  { %v32_v27 = vpop.permute.xlu0 %31 }
  0xdd   :  { %v115_v30 = vpop.f32.mrb[0].mxu0 }
  0xde   :  { %v156_v31 = vpop.f32.mrb[0].mxu1  ;;  %v116_v34 = vadd.f32 %v115_v30, %v32_v27  ;;  %v117_v36 = vpop.f32.mrb[1].mxu0 }
  0xdf   :  { %v157_v35 = vadd.f32 %v156_v31, %v32_v27  ;;  %v158_v37 = vpop.f32.mrb[1].mxu1  ;;  %v118_v38 = vadd.f32 %v117_v36, %v32_v27  ;;  %v119_v42 = vpop.f32.mrb[2].mxu0 }
  0xe0   :  { %v159_v40 = vadd.f32 %v158_v37, %v32_v27  ;;  %v160_v43 = vpop.f32.mrb[2].mxu1  ;;  %v186_v44 = vadd.f32 %v172_v25, %v116_v34  ;;  %v120_v46 = vpop.f32.mrb[3].mxu0 }
  0xe1   :  { %v188_v45 = vadd.f32 %v179_v26, %v157_v35  ;;  %v161_v47 = vpop.f32.mrb[3].mxu1  ;;  %v187_v48 = vadd.f32 %v180_v32, %v118_v38 }
  0xe2   :  { %v189_v49 = vadd.f32 %v181_v33, %v159_v40  ;;  %v213_v50 = vadd.f32 %v199_v28, %v186_v44 }
  0xe3   :  { %v215_v51 = vadd.f32 %v206_v29, %v188_v45  ;;  %v214_v52 = vadd.f32 %v207_v39, %v187_v48 }
  0xe4   :  { %v216_v53 = vadd.f32 %v208_v41, %v189_v49  ;;  %v217_v54 = vmax.f32 %v213_v50, 0.0 }
  0xe5   :  { %v219_v55 = vmax.f32 %v215_v51, 0.0  ;;  %v218_v56 = vmax.f32 %v214_v52, 0.0 }
  0xe6   :  { %v220_v57 = vmax.f32 %v216_v53, 0.0 }
  0xe7   :  { %v225_v58 = vcombine.low %v217_v54, %v218_v56 }
  0xe8   :  { %v226_v59 = vcombine.low %v219_v55, %v220_v57 }
  0xe9   :  { %v233_v60 = vrot.slane %v225_v58, %v171_v22 }
  0xea   :  { %v240_v61 = vrot.slane %v226_v59, %v171_v22 }
  0xec   :  { %v241_v62 = vcombine.low %v233_v60, %v240_v61 }
  0xee   :  { %243 = vst [vmem:[%s349_s5] sm:$0xff] %v241_v62 }

// kernel: _lambda_.18
= control target key start
LH: loop header
LB: loop body
LE: loop exit
PB: predicated region body
PF: predicated region fallthrough
CT: control target
= control target key end

     0   :  { %v31_v0 = vlaneseq  ;;  %v171_v2 = vmov 1983009808   ;;  %v172_v4 = vmov 0   ;;  %vm48_vm0 = vcmask 1041408   ;;  %s231_s1 = inlined_call_operand.vmem [shape: bf16[4,512], index: 1, kind: input, shape index: {}]   ;;  %s232_s2 = inlined_call_operand.vmem [shape: f32[8,1], index: 2, kind: input, shape index: {}]   ;;  %s233_s0 = inlined_call_operand.vmem [shape: bf16[8,4], index: 0, kind: input, shape index: {}]   ;;  %s234_s3 = inlined_call_operand.vmem [shape: f32[8,512], index: 3, kind: input, shape index: {}]   ;;  %s235_s4 = inlined_call_operand.vmem [shape: f32[8,512], index: 4, kind: output, shape index: {}]  }
   0x1   :  { %v19_v1 = vld [vmem:[%s231_s1] sm:$0xff]  ;;  %v29_v3 = vunpack.c.l.s4 %v171_v2  ;;  %93 = vmatprep.mubr.bf16.mxu0 %v172_v4  ;;  %134 = vmatprep.mubr.bf16.mxu1 %v172_v4  ;;  %vm44_vm1 = vcmask 31744   ;;  %v145_v21 = vld [vmem:[%s234_s3 + $0x10] sm:$0xff]  ;;  %v144_v25 = vld [vmem:[%s234_s3 + $0x8] sm:$0xff] }
   0x2   :  { %v20_v5 = vld [vmem:[%s232_s2] sm:$0xff]  ;;  %v32_v6 = vshrl.u32 %v31_v0, 7  ;;  %169 = vset.pattern.permute.xlu0 %v172_v4  ;;  %v27_v8 = vcombine.high %v19_v1, %v19_v1  ;;  %v146_v27 = vld [vmem:[%s234_s3 + $0x18] sm:$0xff] }
   0x3   :  { %v30_v7 = vunpack.c.0.s8 %v29_v3  ;;  %23 = vperm.xlu0 %169, %v20_v5   ;;  %v18_v16 = vld [vmem:[%s233_s0] sm:$0xf] }
   0x4   :  { %v143_v19 = vld [vmem:[%s234_s3] sm:$0xff] }
   0x5   :  { %v33_v9 = vsub.s32 %v30_v7, %v32_v6 }
   0x7   :  { %v34_v10 = vrot.slane %v19_v1, %v33_v9  ;;  %v41_v11 = vrot.slane %v27_v8, %v33_v9 }
   0x9   :  { %v42_v12 = vcombine.high %v34_v10, %v34_v10  ;;  %v43_v13 = vcombine.high %v41_v11, %v41_v11  ;;  %v50_v14 = vsel %vm48_vm0, %v34_v10, 0  ;;  %v56_v15 = vsel %vm48_vm0, %v41_v11, 0 }
   0xb   :  { %163 = vmatprep.subr.msk.bf16.mxu0 %vm48_vm0, %v42_v12  ;;  %165 = vmatprep.subr.msk.bf16.mxu1 %vm48_vm0, %v43_v13 }
   0xc   :  { %62 = vmatpush1.bf16.msra.mxu0 %v50_v14  ;;  %103 = vmatpush1.bf16.msra.mxu1 %v56_v15 }
   0xf   :  { %164 = vmatmul.mubr.msk.bf16.vlgmr.msra.gmra.mrb[0].mxu0 %vm44_vm1, %v18_v16  ;;  %166 = vmatmul.mubr.msk.bf16.vlgmr.msra.gmra.mrb[0].mxu1 %vm44_vm1, %v18_v16 }
  0x82   :  { %v24_v17 = vpop.permute.xlu0 %23 }
  0xe2   :  { %v95_v18 = vpop.f32.mrb[0].mxu0  ;;  %v136_v20 = vpop.f32.mrb[0].mxu1 }
  0xe3   :  { %v96_v22 = vadd.f32 %v95_v18, %v24_v17  ;;  %v137_v23 = vadd.f32 %v136_v20, %v24_v17  ;;  %v97_v24 = vpop.f32.mrb[1].mxu0  ;;  %v138_v26 = vpop.f32.mrb[1].mxu1 }
  0xe4   :  { %v98_v28 = vadd.f32 %v97_v24, %v24_v17  ;;  %v139_v29 = vadd.f32 %v138_v26, %v24_v17  ;;  %v99_v30 = vpop.f32.mrb[2].mxu0  ;;  %v140_v31 = vpop.f32.mrb[2].mxu1 }
  0xe5   :  { %v147_v32 = vadd.f32 %v143_v19, %v96_v22  ;;  %v149_v33 = vadd.f32 %v145_v21, %v137_v23  ;;  %v100_v34 = vpop.f32.mrb[3].mxu0  ;;  %v141_v35 = vpop.f32.mrb[3].mxu1 }
  0xe6   :  { %v148_v36 = vadd.f32 %v144_v25, %v98_v28  ;;  %v150_v37 = vadd.f32 %v146_v27, %v139_v29 }
  0xe7   :  { %v151_v38 = vmax.f32 %v147_v32, 0.0  ;;  %v153_v39 = vmax.f32 %v149_v33, 0.0 }
  0xe8   :  { %v152_v40 = vmax.f32 %v148_v36, 0.0  ;;  %v154_v41 = vmax.f32 %v150_v37, 0.0 }
  0xe9   :  { %155 = vst [vmem:[%s235_s4] sm:$0xff] %v151_v38  ;;  %157 = vst [vmem:[%s235_s4 + $0x10] sm:$0xff] %v153_v39 }
  0xea   :  { %156 = vst [vmem:[%s235_s4 + $0x8] sm:$0xff] %v152_v40  ;;  %158 = vst [vmem:[%s235_s4 + $0x18] sm:$0xff] %v154_v41 }

// kernel: _lambda_.24
= control target key start
LH: loop header
LB: loop body
LE: loop exit
PB: predicated region body
PF: predicated region fallthrough
CT: control target
= control target key end

     0   :  { %v301_v1 = vmov 0   ;;  %vm134_vm0 = vcmask 1043456   ;;  %vm130_vm1 = vcmask 588800   ;;  %s388_s1 = inlined_call_operand.vmem [shape: bf16[72,512], index: 1, kind: input, shape index: {}]   ;;  %s389_s2 = inlined_call_operand.vmem [shape: f32[4,1], index: 2, kind: input, shape index: {}]   ;;  %s390_s0 = inlined_call_operand.vmem [shape: bf16[4,72], index: 0, kind: input, shape index: {}]   ;;  %s391_s3 = inlined_call_operand.vmem [shape: f32[4,512], index: 3, kind: output, shape index: {}]  }
   0x1   :  { %v273_v0 = vld [vmem:[%s388_s1 + $0x4] ss:$16 sps:$4 sm:$0xff]   ;;  %179 = vmatprep.mubr.bf16.mxu0 %v301_v1  ;;  %220 = vmatprep.mubr.bf16.mxu1 %v301_v1  ;;  %v275_v2 = vld [vmem:[%s388_s1 + $0xc] ss:$16 sps:$4 sm:$0xff]   ;;  %v277_v3 = vld [vmem:[%s388_s1] ss:$16 sps:$4 sm:$0xff]  }
   0x2   :  { %272 = vset.pattern.permute.xlu0 %v301_v1  ;;  %147 = vmatprep.subr.bf16.mxu0 %v273_v0  ;;  %v278_v4 = vld [vmem:[%s388_s1 + $0x8] ss:$16 sps:$4 sm:$0xff]   ;;  %v279_v5 = vld [vmem:[%s388_s1 + $0x24] ss:$16 sps:$4 sm:$0xff]   ;;  %v281_v6 = vld [vmem:[%s388_s1 + $0x2c] ss:$16 sps:$4 sm:$0xff]  }
   0x3   :  { %188 = vmatprep.subr.bf16.mxu1 %v275_v2  ;;  %148 = vmatpush1.bf16.msra.mxu0 %v277_v3  ;;  %v283_v7 = vld [vmem:[%s388_s1 + $0x20] ss:$16 sps:$4 sm:$0xff]   ;;  %v284_v8 = vld [vmem:[%s388_s1 + $0x28] ss:$16 sps:$4 sm:$0xff]   ;;  %v285_v9 = vld [vmem:[%s388_s1 + $0x44] ss:$16 sps:$4 sm:$0xff]  }
   0x4   :  { %189 = vmatpush1.bf16.msra.mxu1 %v278_v4  ;;  %149 = vmatprep.subr.bf16.mxu0 %v279_v5  ;;  %v287_v10 = vld [vmem:[%s388_s1 + $0x4c] ss:$16 sps:$4 sm:$0xff]   ;;  %v289_v11 = vld [vmem:[%s388_s1 + $0x40] ss:$16 sps:$4 sm:$0xff]   ;;  %v290_v12 = vld [vmem:[%s388_s1 + $0x48] ss:$16 sps:$4 sm:$0xff]  }
   0x5   :  { %190 = vmatprep.subr.bf16.mxu1 %v281_v6  ;;  %v291_v13 = vld [vmem:[%s388_s1 + $0x64] ss:$16 sps:$4 sm:$0xff]   ;;  %v293_v14 = vld [vmem:[%s388_s1 + $0x6c] ss:$16 sps:$4 sm:$0xff]   ;;  %v34_v17 = vld [vmem:[%s389_s2] sm:$0xf] }
   0x6   :  { %v32_v15 = vld [vmem:[%s388_s1 + $0x80] sm:$0xff]  ;;  %v33_v16 = vld [vmem:[%s388_s1 + $0x88] sm:$0xff]  ;;  %37 = vperm.xlu0 %272, %v34_v17  }
   0x7   :  { %150 = vmatpush1.bf16.msra.mxu0 %v283_v7  ;;  %v295_v18 = vld [vmem:[%s388_s1 + $0x60] ss:$16 sps:$4 sm:$0xff]   ;;  %v296_v19 = vld [vmem:[%s388_s1 + $0x68] ss:$16 sps:$4 sm:$0xff]   ;;  %v264_v20 = vcombine.high %v32_v15, %v32_v15  ;;  %v266_v21 = vcombine.high %v33_v16, %v33_v16  ;;  %v263_v22 = vcombine.low %v32_v15, %v32_v15  ;;  %v265_v23 = vcombine.low %v33_v16, %v33_v16 }
   0x8   :  { %191 = vmatpush1.bf16.msra.mxu1 %v284_v8  ;;  %151 = vmatprep.subr.bf16.mxu0 %v285_v9  ;;  %v15_v26 = vld [vmem:[%s390_s0] sm:$0x3] }
   0x9   :  { %192 = vmatprep.subr.bf16.mxu1 %v287_v10  ;;  %v136_v24 = vsel %vm134_vm0, %v263_v22, 0  ;;  %v142_v25 = vsel %vm134_vm0, %v265_v23, 0 }
   0xb   :  { %152 = vmatpush1.bf16.msra.mxu0 %v289_v11 }
   0xc   :  { %193 = vmatpush1.bf16.msra.mxu1 %v290_v12  ;;  %153 = vmatprep.subr.bf16.mxu0 %v291_v13 }
   0xd   :  { %194 = vmatprep.subr.bf16.mxu1 %v293_v14 }
   0xf   :  { %154 = vmatpush1.bf16.msra.mxu0 %v295_v18 }
  0x10   :  { %195 = vmatpush1.bf16.msra.mxu1 %v296_v19  ;;  %267 = vmatprep.subr.msk.bf16.mxu0 %vm134_vm0, %v264_v20 }
  0x11   :  { %269 = vmatprep.subr.msk.bf16.mxu1 %vm134_vm0, %v266_v21 }
  0x13   :  { %156 = vmatpush1.bf16.msra.mxu0 %v136_v24 }
  0x14   :  { %197 = vmatpush1.bf16.msra.mxu1 %v142_v25 }
  0x16   :  { %268 = vmatmul.mubr.msk.bf16.vlgmr.msra.gmra.mrb[0].mxu0 %vm130_vm1, %v15_v26 }
  0x17   :  { %270 = vmatmul.mubr.msk.bf16.vlgmr.msra.gmra.mrb[0].mxu1 %vm130_vm1, %v15_v26 }
  0x85   :  { %v38_v27 = vpop.permute.xlu0 %37 }
  0xe9   :  { %v181_v28 = vpop.f32.mrb[0].mxu0 }
  0xea   :  { %v222_v29 = vpop.f32.mrb[0].mxu1  ;;  %v182_v30 = vadd.f32 %v181_v28, %v38_v27  ;;  %v183_v32 = vpop.f32.mrb[1].mxu0 }
  0xeb   :  { %v223_v31 = vadd.f32 %v222_v29, %v38_v27  ;;  %v224_v33 = vpop.f32.mrb[1].mxu1  ;;  %v184_v34 = vadd.f32 %v183_v32, %v38_v27  ;;  %v185_v36 = vpop.f32.mrb[2].mxu0 }
  0xec   :  { %v225_v35 = vadd.f32 %v224_v33, %v38_v27  ;;  %v226_v37 = vpop.f32.mrb[2].mxu1  ;;  %v229_v38 = vmax.f32 %v182_v30, 0.0  ;;  %v186_v40 = vpop.f32.mrb[3].mxu0 }
  0xed   :  { %v231_v39 = vmax.f32 %v223_v31, 0.0  ;;  %v227_v41 = vpop.f32.mrb[3].mxu1  ;;  %v230_v42 = vmax.f32 %v184_v34, 0.0 }
  0xee   :  { %v232_v43 = vmax.f32 %v225_v35, 0.0 }
  0xef   :  { %v237_v44 = vcombine.low %v229_v38, %v230_v42 }
  0xf0   :  { %v238_v45 = vcombine.low %v231_v39, %v232_v43 }
  0xf1   :  { %241 = vst [vmem:[%s391_s3] sm:$0xff] %v237_v44 }
  0xf2   :  { %242 = vst [vmem:[%s391_s3 + $0x8] sm:$0xff] %v238_v45 }

// kernel: _lambda_.25
= control target key start
LH: loop header
LB: loop body
LE: loop exit
PB: predicated region body
PF: predicated region fallthrough
CT: control target
= control target key end

     0   :  { %v28_v0 = vlaneseq  ;;  %v156_v2 = vmov 1983009808   ;;  %v157_v4 = vmov 0   ;;  %vm45_vm0 = vcmask 1041408   ;;  %s199_s1 = inlined_call_operand.vmem [shape: bf16[4,512], index: 1, kind: input, shape index: {}]   ;;  %s200_s2 = inlined_call_operand.vmem [shape: f32[5,1], index: 2, kind: input, shape index: {}]   ;;  %s201_s0 = inlined_call_operand.vmem [shape: bf16[5,4], index: 0, kind: input, shape index: {}]   ;;  %s202_s3 = inlined_call_operand.vmem [shape: f32[5,512], index: 3, kind: output, shape index: {}]  }
   0x1   :  { %v16_v1 = vld [vmem:[%s199_s1] sm:$0xff]  ;;  %v26_v3 = vunpack.c.l.s4 %v156_v2  ;;  %90 = vmatprep.mubr.bf16.mxu0 %v157_v4  ;;  %131 = vmatprep.mubr.bf16.mxu1 %v157_v4  ;;  %vm41_vm1 = vcmask 31744  }
   0x2   :  { %v17_v5 = vld [vmem:[%s200_s2] sm:$0x1f]  ;;  %v29_v6 = vshrl.u32 %v28_v0, 7  ;;  %154 = vset.pattern.permute.xlu0 %v157_v4  ;;  %v24_v8 = vcombine.high %v16_v1, %v16_v1 }
   0x3   :  { %v27_v7 = vunpack.c.0.s8 %v26_v3  ;;  %20 = vperm.xlu0 %154, %v17_v5   ;;  %v15_v16 = vld [vmem:[%s201_s0] sm:$0x7] }
   0x5   :  { %v30_v9 = vsub.s32 %v27_v7, %v29_v6 }
   0x7   :  { %v31_v10 = vrot.slane %v16_v1, %v30_v9  ;;  %v38_v11 = vrot.slane %v24_v8, %v30_v9 }
   0x9   :  { %v39_v12 = vcombine.high %v31_v10, %v31_v10  ;;  %v40_v13 = vcombine.high %v38_v11, %v38_v11  ;;  %v47_v14 = vsel %vm45_vm0, %v31_v10, 0  ;;  %v53_v15 = vsel %vm45_vm0, %v38_v11, 0 }
   0xb   :  { %148 = vmatprep.subr.msk.bf16.mxu0 %vm45_vm0, %v39_v12  ;;  %150 = vmatprep.subr.msk.bf16.mxu1 %vm45_vm0, %v40_v13 }
   0xc   :  { %59 = vmatpush1.bf16.msra.mxu0 %v47_v14  ;;  %100 = vmatpush1.bf16.msra.mxu1 %v53_v15 }
   0xf   :  { %149 = vmatmul.mubr.msk.bf16.vlgmr.msra.gmra.mrb[0].mxu0 %vm41_vm1, %v15_v16  ;;  %151 = vmatmul.mubr.msk.bf16.vlgmr.msra.gmra.mrb[0].mxu1 %vm41_vm1, %v15_v16 }
  0x82   :  { %v21_v17 = vpop.permute.xlu0 %20 }
  0xe2   :  { %v92_v18 = vpop.f32.mrb[0].mxu0  ;;  %v133_v19 = vpop.f32.mrb[0].mxu1 }
  0xe3   :  { %v93_v20 = vadd.f32 %v92_v18, %v21_v17  ;;  %v134_v21 = vadd.f32 %v133_v19, %v21_v17  ;;  %v94_v22 = vpop.f32.mrb[1].mxu0  ;;  %v135_v23 = vpop.f32.mrb[1].mxu1 }
  0xe4   :  { %v95_v24 = vadd.f32 %v94_v22, %v21_v17  ;;  %v136_v25 = vadd.f32 %v135_v23, %v21_v17  ;;  %v96_v26 = vpop.f32.mrb[2].mxu0  ;;  %v137_v27 = vpop.f32.mrb[2].mxu1 }
  0xe5   :  { %140 = vst [vmem:[%s202_s3] sm:$0x1f] %v93_v20  ;;  %142 = vst [vmem:[%s202_s3 + $0x10] sm:$0x1f] %v134_v21  ;;  %v97_v28 = vpop.f32.mrb[3].mxu0  ;;  %v138_v29 = vpop.f32.mrb[3].mxu1 }
  0xe6   :  { %141 = vst [vmem:[%s202_s3 + $0x8] sm:$0x1f] %v95_v24  ;;  %143 = vst [vmem:[%s202_s3 + $0x18] sm:$0x1f] %v136_v25 }

</bundles_post_ra>
